<compile_context>
chip_gen: v6e
topology: v6e:2x2x1
jax: 0.10.0
libtpu: 0.0.40
codegen_flags: <defaults>
</compile_context>

<pallas_src>
import functools

import jax
import jax.numpy as jnp
from jax import lax
from jax.experimental import pallas as pl
from jax.experimental.pallas import tpu as pltpu


def _round_up(x, m):
    return ((x + m - 1) // m) * m


def _fused_kernel(x_ref, w0_ref, wt_ref, b0_ref, b1_ref, o_ref, *,
                  n_block, k, d_max, l_valid, l_comp, c_in):
    """Fused conv0+bn0+relu -> merged-phase polyphase convT+bn1+relu.

    x_ref : (n_block, 2*C_in, K-1+l_comp) bf16, "same"-left-padded, zero right pad.
    w0_ref: (K, C_in, 2*C_in)             bf16, BN0 scale folded in (tap-major).
    wt_ref: (d_max, S*C_out, C_in)        bf16, BN1 scale folded in, phases merged.
    b0_ref: (C_in, 1)    f32 BN0 shift.
    b1_ref: (S*C_out, 1) f32 BN1 shift (shift1 tiled over phases).
    o_ref : (n_block, S*C_out, l_comp)    bf16 per-phase lane-dense output planes.
    """
    lane = lax.broadcasted_iota(jnp.int32, (c_in, l_comp), 1)
    h_valid = lane < l_valid
    b0 = b0_ref[...]
    b1 = b1_ref[...]

    def one_batch(nb):
        # ---- stage 1: Conv1d("same") + BN0 shift + ReLU -----------------------
        acc = jnp.dot(w0_ref[0], x_ref[nb, :, pl.ds(0, l_comp)],
                      preferred_element_type=jnp.float32)
        for t in range(1, k):
            acc = acc + jnp.dot(w0_ref[t], x_ref[nb, :, pl.ds(t, l_comp)],
                                preferred_element_type=jnp.float32)
        # Zero everything beyond the true length L: required for the polyphase
        # taps AND it makes the roll-wrapped lanes below exactly correct.
        h32 = jnp.where(h_valid, jnp.maximum(acc + b0, 0.0), 0.0)
        h = h32.astype(jnp.bfloat16)

        # ---- stage 2: polyphase ConvTranspose1d, all phases in one lhs --------
        # y[p*C_out + c, q] = sum_d wt[d, p*C_out + c, :] . h[:, q - d]
        y = jnp.dot(wt_ref[0], h, preferred_element_type=jnp.float32)
        for d in range(1, d_max):
            # h[:, q - d]: lanes that wrap come from columns >= l_valid -> zero.
            hd = pltpu.roll(h32, shift=d, axis=1).astype(jnp.bfloat16)
            y = y + jnp.dot(wt_ref[d], hd, preferred_element_type=jnp.float32)
        y = jnp.maximum(y + b1, 0.0)
        o_ref[nb] = y.astype(o_ref.dtype)

    if n_block == 1:
        one_batch(0)
    else:
        def body(nb, carry):
            one_batch(nb)
            return carry
        lax.fori_loop(0, n_block, body, 0, unroll=2)


def _prepare_operands(params, kernel_size, stride, eps=1e-5):
    """Fold eval-mode BN scales into the conv weights, build merged polyphase taps."""
    k, s = kernel_size, stride
    scale0 = params["gamma0"] / jnp.sqrt(params["var0"] + eps)
    shift0 = params["beta0"] - params["mean0"] * scale0
    scale1 = params["gamma1"] / jnp.sqrt(params["var1"] + eps)
    shift1 = params["beta1"] - params["mean1"] * scale1

    # conv0 weight (C_in, 2*C_in, K): fold BN0 scale, reorder tap-major, bf16.
    w0s = params["w0"] * scale0[:, None, None]
    w0_taps = jnp.transpose(w0s, (2, 0, 1)).astype(jnp.bfloat16)

    # convt weight (C_in, C_out, K): fold BN1 scale, merged polyphase taps:
    #   wt_merged[d, p*C_out + c, ci] = wts[ci, c, d*s + p]   (0 if tap >= K)
    wts = params["wt"] * scale1[None, :, None]
    c_in, c_out, _ = wts.shape
    d_max = (k - 1) // s + 1
    blocks = []
    for d in range(d_max):
        for p in range(s):
            t = d * s + p
            if t < k:
                blocks.append(jnp.transpose(wts[:, :, t]))           # (C_out, C_in)
            else:
                blocks.append(jnp.zeros((c_out, c_in), jnp.float32))
    wt_merged = (jnp.stack(blocks)
                 .reshape(d_max, s * c_out, c_in)
                 .astype(jnp.bfloat16))

    b0 = shift0.reshape(c_in, 1).astype(jnp.float32)
    b1 = jnp.tile(shift1, s).reshape(s * c_out, 1).astype(jnp.float32)
    return w0_taps, wt_merged, b0, b1, d_max


def conv_trans_block_forward(x, params, *, kernel_size, stride, batch_block=None):
    """x: (N, 2*C_in, L) f32.  Returns (N, C_out, (L-1)*stride + kernel_size) f32."""
    n, c2, l = x.shape
    c_in = c2 // 2
    k, s = kernel_size, stride
    c_out = params["wt"].shape[1]

    w0_taps, wt_merged, b0, b1, d_max = _prepare_operands(params, k, s)

    pad_l = (k - 1) // 2                       # PyTorch F.pad "same" split (odd/even K)
    l_out = (l - 1) * s + k                    # true ConvTranspose1d output length
    l_q = l + d_max - 1                        # per-phase positions actually needed
    l_comp = _round_up(l_q, 128)               # lane-dense compute width
    l_x = k - 1 + l_comp                       # padded input length seen by the kernel

    if batch_block is None:
        # A few MiB of blocks per grid step, and keep >=2 grid steps when the batch
        # allows it so megacore / both v7x TensorCores get independent work.
        per_n_bytes = 2 * (2 * c_in * l_x + s * c_out * l_comp)     # bf16 in + out
        cap = max(1, (4 * 1024 * 1024) // max(per_n_bytes, 1))
        batch_block = int(max(1, min(cap, 16, -(-n // 2))))
    n_pad = _round_up(n, batch_block)

    xp = jnp.pad(x, ((0, n_pad - n), (0, 0), (pad_l, l_x - pad_l - l)))
    xp = xp.astype(jnp.bfloat16)               # halve HBM->VMEM traffic

    kernel = functools.partial(
        _fused_kernel, n_block=batch_block, k=k, d_max=d_max,
        l_valid=l, l_comp=l_comp, c_in=c_in)

    out = pl.pallas_call(
        kernel,
        out_shape=jax.ShapeDtypeStruct((n_pad, s * c_out, l_comp), jnp.bfloat16),
        grid_spec=pltpu.PrefetchScalarGridSpec(
            num_scalar_prefetch=0,
            grid=(n_pad // batch_block,),
            in_specs=[
                pl.BlockSpec((batch_block, 2 * c_in, l_x), lambda i: (i, 0, 0)),
                pl.BlockSpec((k, c_in, 2 * c_in), lambda i: (0, 0, 0)),
                pl.BlockSpec((d_max, s * c_out, c_in), lambda i: (0, 0, 0)),
                pl.BlockSpec((c_in, 1), lambda i: (0, 0)),
                pl.BlockSpec((s * c_out, 1), lambda i: (0, 0)),
            ],
            out_specs=pl.BlockSpec((batch_block, s * c_out, l_comp),
                                   lambda i: (i, 0, 0)),
        ),
        compiler_params=pltpu.CompilerParams(
            dimension_semantics=("parallel",),
            vmem_limit_bytes=48 * 1024 * 1024),
    )(xp, w0_taps, wt_merged, b0, b1)

    # Interleave the phase planes: y[n, c, q*stride + p] = out[n, p*C_out + c, q].
    # Done on bf16 (half the bytes of the v1 f32 pass); cast to f32 at the end.
    y = out[:n].reshape(n, s, c_out, l_comp)[:, :, :, :l_q]
    y = jnp.transpose(y, (0, 2, 3, 1)).reshape(n, c_out, l_q * s)
    return y[:, :, :l_out].astype(jnp.float32)


def reference_forward(x, params, *, kernel_size, stride):
    """Pure-JAX reference (lax convolutions) using identically quantized operands."""
    k, s = kernel_size, stride
    pad_l = (k - 1) // 2
    pad_r = k - 1 - pad_l
    eps = 1e-5
    q = lambda a: a.astype(jnp.bfloat16).astype(jnp.float32)

    scale0 = params["gamma0"] / jnp.sqrt(params["var0"] + eps)
    shift0 = params["beta0"] - params["mean0"] * scale0
    scale1 = params["gamma1"] / jnp.sqrt(params["var1"] + eps)
    shift1 = params["beta1"] - params["mean1"] * scale1

    # Match the kernel's operand quantization exactly (bf16 x / weights / h).
    xq = q(x)
    w0q = q(params["w0"] * scale0[:, None, None])
    wtq = q(params["wt"] * scale1[None, :, None])

    dn = ("NCH", "OIH", "NCH")
    xp = jnp.pad(xq, ((0, 0), (0, 0), (pad_l, pad_r)))
    h = lax.conv_general_dilated(xp, w0q, (1,), "VALID", dimension_numbers=dn,
                                 precision=lax.Precision.HIGHEST)
    h = jnp.maximum(h + shift0[None, :, None], 0.0)
    h = q(h)                                     # kernel feeds stage 2 with bf16 h

    w_eq = jnp.transpose(wtq[:, :, ::-1], (1, 0, 2))
    y = lax.conv_general_dilated(h, w_eq, (1,), [(k - 1, k - 1)],
                                 lhs_dilation=(s,), dimension_numbers=dn,
                                 precision=lax.Precision.HIGHEST)
    return jnp.maximum(y + shift1[None, :, None], 0.0)


if __name__ == "__main__":
    # Small shapes consistent with ConvTransBlock (forward x: (N, 2*C_in, L)).
    N, C_in, C_out, L, K, S = 2, 4, 4, 16, 3, 2
    key = jax.random.PRNGKey(0)
    keys = jax.random.split(key, 10)
    x = jax.random.normal(keys[0], (N, 2 * C_in, L), jnp.float32)
    params = dict(
        # conv0: Conv1d(2*C_in -> C_in, K, bias=False) weight (C_in, 2*C_in, K)
        w0=0.1 * jax.random.normal(keys[1], (C_in, 2 * C_in, K), jnp.float32),
        # convt: ConvTranspose1d(C_in -> C_out, K, stride=S, bias=False) weight (C_in, C_out, K)
        wt=0.1 * jax.random.normal(keys[2], (C_in, C_out, K), jnp.float32),
        # bn0 (C_in): gamma/beta + running mean/var (inference mode)
        gamma0=1.0 + 0.1 * jax.random.normal(keys[3], (C_in,), jnp.float32),
        beta0=0.1 * jax.random.normal(keys[4], (C_in,), jnp.float32),
        mean0=0.1 * jax.random.normal(keys[5], (C_in,), jnp.float32),
        var0=jnp.abs(jax.random.normal(keys[6], (C_in,), jnp.float32)) + 0.5,
        # bn1 (C_out)
        gamma1=1.0 + 0.1 * jax.random.normal(keys[7], (C_out,), jnp.float32),
        beta1=0.1 * jax.random.normal(keys[8], (C_out,), jnp.float32),
        mean1=0.1 * jax.random.normal(keys[9], (C_out,), jnp.float32),
        var1=jnp.ones((C_out,), jnp.float32),
    )

    fwd = jax.jit(conv_trans_block_forward,
                  static_argnames=("kernel_size", "stride", "batch_block"))

    out = jax.block_until_ready(fwd(x, params, kernel_size=K, stride=S))
    assert out.shape == (N, C_out, (L - 1) * S + K), out.shape

    ref = reference_forward(x, params, kernel_size=K, stride=S)
    max_err = float(jnp.max(jnp.abs(out - ref)))
    assert jnp.allclose(out, ref, atol=2e-2, rtol=2e-2), max_err

    # Also exercise the multi-sample-per-grid-step (fori_loop) path.
    out2 = jax.block_until_ready(fwd(x, params, kernel_size=K, stride=S, batch_block=2))
    max_err2 = float(jnp.max(jnp.abs(out2 - ref)))
    assert jnp.allclose(out2, ref, atol=2e-2, rtol=2e-2), max_err2

    print("KERNEL_OK")
</pallas_src>

<mosaic_0001>
module attributes {stable_mosaic.version = 11 : i64} {
  func.func @_fused_kernel(%arg0: i32, %arg1: memref<1x8x130xbf16, #tpu.memory_space<vmem>>, %arg2: memref<3x4x8xbf16, #tpu.memory_space<vmem>>, %arg3: memref<2x8x4xbf16, #tpu.memory_space<vmem>>, %arg4: memref<4x1xf32, #tpu.memory_space<vmem>>, %arg5: memref<8x1xf32, #tpu.memory_space<vmem>>, %arg6: memref<1x8x128xbf16, #tpu.memory_space<vmem>>) attributes {dimension_semantics = [#tpu.dimension_semantics<parallel>], iteration_bounds = array<i64: 2>, scalar_prefetch = 0 : i64, scratch_operands = 0 : i64, tpu.core_type = #tpu.core_type<tc>, window_params = [{transform_indices = @transform_0, window_bounds = array<i64: 1, 8, 130>}, {pipeline_mode = #tpu.pipeline_mode<synchronous>, transform_indices = @transform_1, window_bounds = array<i64: 3, 4, 8>}, {pipeline_mode = #tpu.pipeline_mode<synchronous>, transform_indices = @transform_2, window_bounds = array<i64: 2, 8, 4>}, {pipeline_mode = #tpu.pipeline_mode<synchronous>, transform_indices = @transform_3, window_bounds = array<i64: 4, 1>}, {pipeline_mode = #tpu.pipeline_mode<synchronous>, transform_indices = @transform_4, window_bounds = array<i64: 8, 1>}, {transform_indices = @transform_5, window_bounds = array<i64: 1, 8, 128>}]} {
    %0 = tpu.iota {dimensions = array<i32: 1>} : vector<4x128xi32>
    %c16_i32 = arith.constant 16 : i32
    %1 = vector.broadcast %c16_i32 : i32 to vector<4x128xi32>
    %2 = arith.cmpi slt, %0, %1 : vector<4x128xi32>
    %c0 = arith.constant 0 : index
    %c0_0 = arith.constant 0 : index
    %3 = vector.load %arg4[%c0, %c0_0] : memref<4x1xf32, #tpu.memory_space<vmem>>, vector<4x1xf32>
    %c0_1 = arith.constant 0 : index
    %c0_2 = arith.constant 0 : index
    %4 = vector.load %arg5[%c0_1, %c0_2] : memref<8x1xf32, #tpu.memory_space<vmem>>, vector<8x1xf32>
    %c0_3 = arith.constant 0 : index
    %c0_4 = arith.constant 0 : index
    %c0_5 = arith.constant 0 : index
    %5 = vector.load %arg2[%c0_3, %c0_4, %c0_5] : memref<3x4x8xbf16, #tpu.memory_space<vmem>>, vector<1x4x8xbf16>
    %6 = vector.shape_cast %5 : vector<1x4x8xbf16> to vector<4x8xbf16>
    %c0_6 = arith.constant 0 : index
    %c0_7 = arith.constant 0 : index
    %c0_8 = arith.constant 0 : index
    %7 = vector.load %arg1[%c0_6, %c0_7, %c0_8] : memref<1x8x130xbf16, #tpu.memory_space<vmem>>, vector<1x8x128xbf16>
    %8 = vector.shape_cast %7 : vector<1x8x128xbf16> to vector<8x128xbf16>
    %cst = arith.constant dense<0.000000e+00> : vector<4x128xf32>
    %9 = tpu.matmul %6, %8, %cst {dimension_numbers = #tpu.dot_dimension_numbers<[1], [0], [0], [1], [0, 0, 1, 1], [], []>} : vector<4x8xbf16>, vector<8x128xbf16>, vector<4x128xf32> -> vector<4x128xf32>
    %c1 = arith.constant 1 : index
    %c0_9 = arith.constant 0 : index
    %c0_10 = arith.constant 0 : index
    %10 = vector.load %arg2[%c1, %c0_9, %c0_10] : memref<3x4x8xbf16, #tpu.memory_space<vmem>>, vector<1x4x8xbf16>
    %11 = vector.shape_cast %10 : vector<1x4x8xbf16> to vector<4x8xbf16>
    %c0_11 = arith.constant 0 : index
    %c0_12 = arith.constant 0 : index
    %c1_13 = arith.constant 1 : index
    %12 = vector.load %arg1[%c0_11, %c0_12, %c1_13] : memref<1x8x130xbf16, #tpu.memory_space<vmem>>, vector<1x8x128xbf16>
    %13 = vector.shape_cast %12 : vector<1x8x128xbf16> to vector<8x128xbf16>
    %cst_14 = arith.constant dense<0.000000e+00> : vector<4x128xf32>
    %14 = tpu.matmul %11, %13, %cst_14 {dimension_numbers = #tpu.dot_dimension_numbers<[1], [0], [0], [1], [0, 0, 1, 1], [], []>} : vector<4x8xbf16>, vector<8x128xbf16>, vector<4x128xf32> -> vector<4x128xf32>
    %15 = arith.addf %9, %14 : vector<4x128xf32>
    %c2 = arith.constant 2 : index
    %c0_15 = arith.constant 0 : index
    %c0_16 = arith.constant 0 : index
    %16 = vector.load %arg2[%c2, %c0_15, %c0_16] : memref<3x4x8xbf16, #tpu.memory_space<vmem>>, vector<1x4x8xbf16>
    %17 = vector.shape_cast %16 : vector<1x4x8xbf16> to vector<4x8xbf16>
    %c0_17 = arith.constant 0 : index
    %c0_18 = arith.constant 0 : index
    %c2_19 = arith.constant 2 : index
    %18 = vector.load %arg1[%c0_17, %c0_18, %c2_19] : memref<1x8x130xbf16, #tpu.memory_space<vmem>>, vector<1x8x128xbf16>
    %19 = vector.shape_cast %18 : vector<1x8x128xbf16> to vector<8x128xbf16>
    %cst_20 = arith.constant dense<0.000000e+00> : vector<4x128xf32>
    %20 = tpu.matmul %17, %19, %cst_20 {dimension_numbers = #tpu.dot_dimension_numbers<[1], [0], [0], [1], [0, 0, 1, 1], [], []>} : vector<4x8xbf16>, vector<8x128xbf16>, vector<4x128xf32> -> vector<4x128xf32>
    %21 = arith.addf %15, %20 : vector<4x128xf32>
    %22 = vector.broadcast %3 : vector<4x1xf32> to vector<4x128xf32>
    %23 = arith.addf %21, %22 : vector<4x128xf32>
    %cst_21 = arith.constant 0.000000e+00 : f32
    %24 = vector.broadcast %cst_21 : f32 to vector<4x128xf32>
    %25 = arith.maximumf %23, %24 : vector<4x128xf32>
    %cst_22 = arith.constant 0.000000e+00 : f32
    %26 = vector.broadcast %cst_22 : f32 to vector<4x128xf32>
    %27 = arith.select %2, %25, %26 : vector<4x128xi1>, vector<4x128xf32>
    %28 = arith.truncf %27 : vector<4x128xf32> to vector<4x128xbf16>
    %c0_23 = arith.constant 0 : index
    %c0_24 = arith.constant 0 : index
    %c0_25 = arith.constant 0 : index
    %29 = vector.load %arg3[%c0_23, %c0_24, %c0_25] : memref<2x8x4xbf16, #tpu.memory_space<vmem>>, vector<1x8x4xbf16>
    %30 = vector.shape_cast %29 : vector<1x8x4xbf16> to vector<8x4xbf16>
    %cst_26 = arith.constant dense<0.000000e+00> : vector<8x128xf32>
    %31 = tpu.matmul %30, %28, %cst_26 {dimension_numbers = #tpu.dot_dimension_numbers<[1], [0], [0], [1], [0, 0, 1, 1], [], []>} : vector<8x4xbf16>, vector<4x128xbf16>, vector<8x128xf32> -> vector<8x128xf32>
    %c1_i32 = arith.constant 1 : i32
    %32 = tpu.dynamic_rotate %27 by %c1_i32 dim 1 : vector<4x128xf32>, i32 -> vector<4x128xf32>
    %33 = arith.truncf %32 : vector<4x128xf32> to vector<4x128xbf16>
    %c1_27 = arith.constant 1 : index
    %c0_28 = arith.constant 0 : index
    %c0_29 = arith.constant 0 : index
    %34 = vector.load %arg3[%c1_27, %c0_28, %c0_29] : memref<2x8x4xbf16, #tpu.memory_space<vmem>>, vector<1x8x4xbf16>
    %35 = vector.shape_cast %34 : vector<1x8x4xbf16> to vector<8x4xbf16>
    %cst_30 = arith.constant dense<0.000000e+00> : vector<8x128xf32>
    %36 = tpu.matmul %35, %33, %cst_30 {dimension_numbers = #tpu.dot_dimension_numbers<[1], [0], [0], [1], [0, 0, 1, 1], [], []>} : vector<8x4xbf16>, vector<4x128xbf16>, vector<8x128xf32> -> vector<8x128xf32>
    %37 = arith.addf %31, %36 : vector<8x128xf32>
    %38 = vector.broadcast %4 : vector<8x1xf32> to vector<8x128xf32>
    %39 = arith.addf %37, %38 : vector<8x128xf32>
    %cst_31 = arith.constant 0.000000e+00 : f32
    %40 = vector.broadcast %cst_31 : f32 to vector<8x128xf32>
    %41 = arith.maximumf %39, %40 : vector<8x128xf32>
    %42 = arith.truncf %41 : vector<8x128xf32> to vector<8x128xbf16>
    %c0_32 = arith.constant 0 : index
    %c0_33 = arith.constant 0 : index
    %c0_34 = arith.constant 0 : index
    %43 = vector.load %arg6[%c0_32, %c0_33, %c0_34] : memref<1x8x128xbf16, #tpu.memory_space<vmem>>, vector<1x8x128xbf16>
    %44 = vector.shape_cast %43 : vector<1x8x128xbf16> to vector<8x128xbf16>
    %45 = vector.shape_cast %42 : vector<8x128xbf16> to vector<1x8x128xbf16>
    tpu.vector_store %arg6[%c0_32, %c0_33, %c0_34], %45 {strides = array<i32>} : memref<1x8x128xbf16, #tpu.memory_space<vmem>>, vector<1x8x128xbf16>,
    return
  }
  func.func @transform_0(%arg0: i32) -> (i32, i32, i32) {
    %c0_i32 = arith.constant 0 : i32
    %c0_i32_0 = arith.constant 0 : i32
    %c0_i32_1 = arith.constant 0 : i32
    return %arg0, %c0_i32, %c0_i32_0 : i32, i32, i32
  }
  func.func @transform_1(%arg0: i32) -> (i32, i32, i32) {
    %c0_i32 = arith.constant 0 : i32
    %c0_i32_0 = arith.constant 0 : i32
    %c0_i32_1 = arith.constant 0 : i32
    %c0_i32_2 = arith.constant 0 : i32
    return %c0_i32, %c0_i32_0, %c0_i32_1 : i32, i32, i32
  }
  func.func @transform_2(%arg0: i32) -> (i32, i32, i32) {
    %c0_i32 = arith.constant 0 : i32
    %c0_i32_0 = arith.constant 0 : i32
    %c0_i32_1 = arith.constant 0 : i32
    %c0_i32_2 = arith.constant 0 : i32
    return %c0_i32, %c0_i32_0, %c0_i32_1 : i32, i32, i32
  }
  func.func @transform_3(%arg0: i32) -> (i32, i32) {
    %c0_i32 = arith.constant 0 : i32
    %c0_i32_0 = arith.constant 0 : i32
    %c0_i32_1 = arith.constant 0 : i32
    return %c0_i32, %c0_i32_0 : i32, i32
  }
  func.func @transform_4(%arg0: i32) -> (i32, i32) {
    %c0_i32 = arith.constant 0 : i32
    %c0_i32_0 = arith.constant 0 : i32
    %c0_i32_1 = arith.constant 0 : i32
    return %c0_i32, %c0_i32_0 : i32, i32
  }
  func.func @transform_5(%arg0: i32) -> (i32, i32, i32) {
    %c0_i32 = arith.constant 0 : i32
    %c0_i32_0 = arith.constant 0 : i32
    %c0_i32_1 = arith.constant 0 : i32
    return %arg0, %c0_i32, %c0_i32_0 : i32, i32, i32
  }
}

</mosaic_0001>

<bundles_post_ra>
// kernel: tile.8
= control target key start
LH: loop header
LB: loop body
LE: loop exit
PB: predicated region body
PF: predicated region fallthrough
CT: control target
= control target key end

     0   :  { %s22_s0 = inlined_call_operand.vmem [shape: f32[4], index: 0, kind: input, shape index: {}]   ;;  %s23_s1 = inlined_call_operand.vmem [shape: f32[2,4], index: 1, kind: output, shape index: {}]  }
   0x1   :  { %v4_v0 = vld [vmem:[%s22_s0] ss:$0 sm:$0xff] }
   0x2   :  { %5 = vst [vmem:[%s23_s1] sm:$0x3] %v4_v0 }

// kernel: tile.0
= control target key start
LH: loop header
LB: loop body
LE: loop exit
PB: predicated region body
PF: predicated region fallthrough
CT: control target
= control target key end

     0   :  { %s35_s8 = smov 125   ;;  %vm8_vm0 = vcmask 7168   ;;  %s36_s11 = smov 126   ;;  %s62_s0 = inlined_call_operand.vmem [shape: f32[2,4], index: 0, kind: input, shape index: {}]   ;;  %s63_s1 = inlined_call_operand.vmem [shape: f32[8,1], index: 1, kind: output, shape index: {}]  }
   0x1   :  { %v5_v0 = vld [vmem:[%s62_s0] sm:$0x3]  ;;  %s34_s0 = smov 127  }
   0x2   :  { %6 = vst [vmem:[#allocation0] sm:$0x3] %v5_v0 }
   0x9   :  { %v10_v1 = vld [vmem:[#allocation0] sm:$0x3]  }
   0xa   :  { %v22_v2 = vld [vmem:[#allocation0] sm:$0x3]   ;;  %11 = vrot.lane.b32.xlu0 %v10_v1, %s34_s0 }
   0xb   :  { %23 = vrot.lane.b32.xlu1 %v22_v2, %s35_s8  ;;  %v7_v3 = vld [vmem:[#allocation0] sm:$0x3]  }
   0xc   :  { %v16_v4 = vld [vmem:[#allocation0] sm:$0x3]   ;;  %9 = vst.msk [vmem:[%s63_s1] ss:$4 sm:$0x3] %vm8_vm0, %v7_v3  }
   0xe   :  { %17 = vrot.lane.b32.xlu0 %v16_v4, %s36_s11 }
  0x7c   :  { %v12_v5 = vpop.permute.xlu0 %11  }
  0x7d   :  { %v24_v6 = vpop.permute.xlu1 %23   ;;  %28 = vst.msk [vmem:[%s63_s1 + $0x1] ss:$4 sm:$0x3] %vm8_vm0, %v12_v5  }
  0x7e   :  { %30 = vst.msk [vmem:[%s63_s1 + $0x3] ss:$4 sm:$0x3] %vm8_vm0, %v24_v6  }
  0x80   :  { %v18_v7 = vpop.permute.xlu0 %17  }
  0x81   :  { %29 = vst.msk [vmem:[%s63_s1 + $0x2] ss:$4 sm:$0x3] %vm8_vm0, %v18_v7  }

// kernel: conv_trans_block_forward.1
= control target key start
LH: loop header
LB: loop body
LE: loop exit
PB: predicated region body
PF: predicated region fallthrough
CT: control target
= control target key end

     0   :  { %s688_s18 = smov 0   ;;  %s741_s0 = inlined_call_operand.vmem [shape: bf16[2,8,130], index: 0, kind: input, shape index: {}]   ;;  %s742_s1 = inlined_call_operand.vmem [shape: bf16[3,4,8], index: 1, kind: input, shape index: {}]   ;;  %s743_s2 = inlined_call_operand.vmem [shape: bf16[2,8,4], index: 2, kind: input, shape index: {}]   ;;  %s744_s3 = inlined_call_operand.vmem [shape: f32[4,1], index: 3, kind: input, shape index: {}]   ;;  %s745_s4 = inlined_call_operand.vmem [shape: f32[8,1], index: 4, kind: input, shape index: {}]   ;;  %s746_s5 = inlined_call_operand.vmem [shape: bf16[2,8,128], index: 5, kind: output, shape index: {}]  }
   0x1 LB: > { %s565_s19 = sadd.s32 4294967295, %s650_s18   ;;  %p569_p0 = scmp.ge.s32.totalorder %s650_s18, 1  ;;  %s650_s18 = sphi %s688_s18, %s15_s18  }
   0x2   : > { %p187_p1 = scmp.lt.s32.totalorder %s650_s18, 3 }
   0x4   : > { %p188_p2 = pnand %p569_p0, %p187_p1 }
   0x5   : > { %p214_p3 = scmp.lt.s32.totalorder (!%p188_p2), %s565_s19, 1  ;;  %s654_s26 = smov (!%p188_p2), 127  }
   0x6   : > { %191 = sbr.rel (%p188_p2) target bundleno = 672 (0x2a0), region = 40  ;;  %s655_s27 = smov (!%p188_p2), 126  }
   0x7   : > { %s657_s9 = smov (!%p188_p2), 1  }
   0xb   : > { %v652_v0 = vmov 0.0   ;;  %s748_s19 = smov (!%p214_p3, %s565_s19), 1  ;;  %vm653_vm0 = vmmov 0   ;;  %vm249_vm1 = vcmask 1043456   ;;  %vm245_vm2 = vcmask 64512   ;;  %v228_v40 = vld [vmem:[%s745_s4] sm:$0xff] }
   0xc   : > { %596 = vmatprep.subr.bf16.mxu0 %v652_v0  ;;  %602 = vmatprep.subr.bf16.mxu1 %v652_v0  ;;  %s585_s20 = sshll.u32 %s748_s19, 3  ;;  %v229_v5 = vld [vmem:[%s742_s1] sm:$0x3]  ;;  %v656_v7 = vmov 0   ;;  %vm243_vm3 = vcmask 1039360   ;;  %vm345_vm4 = vcmask 1031168   ;;  %v224_v26 = vlaneseq }
   0xd   : > { %598 = vmatprep.mubr.msk.bf16.mxu0 %vm653_vm0, %v652_v0  ;;  %604 = vmatprep.mubr.msk.bf16.mxu1 %vm653_vm0, %v652_v0  ;;  %s218_s23 = scalar_lea.vmem %s741_s0, %s585_s20  ;;  %v227_v8 = vld [vmem:[%s744_s3] sm:$0xf]  ;;  %v578_v18 = vld [vmem:[%s742_s1 + $0x4] sm:$0x3]  ;;  %vm413_vm6 = vcmask 1041408   ;;  %vm409_vm7 = vcmask 31744  }
   0xe   : > { %v233_v1 = vld [vmem:[%s218_s23] sm:$0xff]  ;;  %640 = vset.pattern.permute.xlu0 %v656_v7  ;;  %641 = vset.pattern.permute.xlu1 %v656_v7  ;;  %v225_v31 = vand.u32 127, %v224_v26  ;;  %s572_s16 = sshll.u32 %s748_s19, 2 }
   0xf   : > { %v230_v2 = vld [vmem:[%s218_s23] sm:$0xf]  ;;  %v574_v3 = vcombine.low %v233_v1, %v233_v1  ;;  %v575_v6 = vcombine.high %v233_v1, %v233_v1  ;;  %v580_v46 = vld [vmem:[%s743_s2 + $0x4] sm:$0xf]  ;;  %s222_s21 = scalar_lea.vmem %s746_s5, %s572_s16 }
  0x10   : > { %v297_v4 = vsel %vm249_vm1, %v230_v2, 0  ;;  %v573_v16 = vld [vmem:[%s742_s1 + $0x2] sm:$0x3]  ;;  %vm226_vm5 = vcmp.lt.s32.totalorder %v225_v31, 16 }
  0x11   : > { %603 = vmatpush3.bf16.msra.mxu1 %v297_v4  ;;  %239 = vrot.lane.b32.xlu0 %v574_v3, %s654_s26  ;;  %v403_v42 = vld [vmem:[%s743_s2] sm:$0xf] }
  0x12   : > { %341 = vrot.lane.b32.xlu1 %v574_v3, %s655_s27  ;;  %614 = vmatprep.subr.bf16.mxu1 %v652_v0 }
  0x14   : > { %605 = vmatmul.mubr.msk.bf16.vlgmr.msra.gmra.mxu1 %vm245_vm2, %v229_v5 }
  0x15   : > { %616 = vmatprep.mubr.msk.bf16.mxu1 %vm653_vm0, %v652_v0  ;;  %241 = vrot.lane.b32.xlu0 %v575_v6, %s654_s26 }
  0x16   : > { %343 = vrot.lane.b32.xlu1 %v575_v6, %s655_s27 }
  0x19   : > { %396 = vperm.xlu0 %640, %v227_v8  }
  0x83   : > { %v240_v9 = vpop.permute.xlu0 %239 }
  0x84   : > { %v342_v10 = vpop.permute.xlu1 %341 }
  0x87   : > { %v242_v11 = vpop.permute.xlu0 %241 }
  0x88   : > { %v344_v12 = vpop.permute.xlu1 %343  ;;  %v244_v13 = vsel %vm243_vm3, %v240_v9, %v242_v11 }
  0x89   : > { %v346_v14 = vsel %vm345_vm4, %v342_v10, %v344_v12  ;;  %v251_v15 = vsel %vm249_vm1, %v244_v13, 0 }
  0x8a   : > { %597 = vmatpush3.bf16.msra.mxu0 %v251_v15  ;;  %v351_v17 = vsel %vm249_vm1, %v346_v14, 0 }
  0x8b   : > { %608 = vmatprep.subr.bf16.mxu0 %v652_v0 }
  0x8d   : > { %599 = vmatmul.mubr.msk.bf16.vlgmr.msra.gmra.mxu0 %vm245_vm2, %v573_v16 }
  0x8e   : > { %609 = vmatpush3.bf16.msra.mxu0 %v351_v17  ;;  %610 = vmatprep.mubr.msk.bf16.mxu0 %vm653_vm0, %v652_v0 }
  0x8f   : > { %620 = vmatprep.subr.bf16.mxu0 %v652_v0 }
  0x94   : > { %v397_v30 = vpop.permute.xlu0 %396 }
  0x95   : > { %611 = vmatmul.mubr.msk.bf16.vlgmr.msra.gmra.mxu0 %vm245_vm2, %v578_v18 }
  0x96   : > { %622 = vmatprep.mubr.msk.bf16.mxu0 %vm653_vm0, %v652_v0 }
  0xd4   : > { %v333_v19 = vpop.f32.mrf.mxu1 }
  0xd6   : > { %v606_v20 = vpop.f32.mrf.mxu1 }
  0xd8   : > { %v336_v21 = vpop.f32.mrf.mxu1 }
  0xda   : > { %v607_v22 = vpop.f32.mrf.mxu1 }
 0x14d   : > { %v287_v23 = vpop.f32.mrf.mxu0 }
 0x14e   : > { %v334_v28 = vadd.f32 %v333_v19, %v287_v23 }
 0x14f   : > { %v600_v24 = vpop.f32.mrf.mxu0 }
 0x151   : > { %v290_v25 = vpop.f32.mrf.mxu0 }
 0x153   : > { %v601_v27 = vpop.f32.mrf.mxu0 }
 0x155   : > { %v387_v29 = vpop.f32.mrf.mxu0 }
 0x156   : > { %v393_v32 = vadd.f32 %v387_v29, %v334_v28 }
 0x157   : > { %v612_v33 = vpop.f32.mrf.mxu0 }
 0x158   : > { %v399_v34 = vadd.f32 %v397_v30, %v393_v32 }
 0x159   : > { %v390_v35 = vpop.f32.mrf.mxu0 }
 0x15a   : > { %v400_v36 = vmax.f32 %v399_v34, 0.0 }
 0x15b   : > { %v613_v37 = vpop.f32.mrf.mxu0 }
 0x15c   : > { %v401_v38 = vsel %vm226_vm5, %v400_v36, 0.0 }
 0x15d   : > { %404 = vrot.lane.b32.xlu1 %v401_v38, %s657_s9  ;;  %v402_v39 = vpack.c.bf16 %v401_v38, %v401_v38 }
 0x15f   : > { %v461_v41 = vsel %vm413_vm6, %v402_v39, 0 }
 0x160   : > { %621 = vmatpush3.bf16.msra.mxu0 %v461_v41 }
 0x161   : > { %505 = vperm.xlu1 %641, %v228_v40  }
 0x163   : > { %623 = vmatmul.mubr.msk.bf16.vlgmr.msra.gmra.mxu0 %vm409_vm7, %v403_v42 }
 0x1cf   : > { %v405_v43 = vpop.permute.xlu1 %404 }
 0x1d0   : > { %v406_v44 = vpack.c.bf16 %v405_v43, %v405_v43 }
 0x1d2   : > { %v415_v45 = vsel %vm413_vm6, %v406_v44, 0 }
 0x1d3   : > { %615 = vmatpush3.bf16.msra.mxu1 %v415_v45 }
 0x1d6   : > { %617 = vmatmul.mubr.msk.bf16.vlgmr.msra.gmra.mxu1 %vm409_vm7, %v580_v46 }
 0x1dc   : > { %v506_v52 = vpop.permute.xlu1 %505 }
 0x223   : > { %v497_v47 = vpop.f32.mrf.mxu0 }
 0x225   : > { %v624_v48 = vpop.f32.mrf.mxu0 }
 0x227   : > { %v500_v49 = vpop.f32.mrf.mxu0 }
 0x229   : > { %v625_v50 = vpop.f32.mrf.mxu0 }
 0x296   : > { %v451_v51 = vpop.f32.mrf.mxu1 }
 0x297   : > { %v498_v53 = vadd.f32 %v497_v47, %v451_v51 }
 0x298   : > { %v618_v54 = vpop.f32.mrf.mxu1 }
 0x299   : > { %v508_v55 = vadd.f32 %v506_v52, %v498_v53 }
 0x29a   : > { %v454_v56 = vpop.f32.mrf.mxu1 }
 0x29b   : > { %v509_v57 = vmax.f32 %v508_v55, 0.0 }
 0x29c   : > { %v619_v58 = vpop.f32.mrf.mxu1 }
 0x29d   : > { %v510_v59 = vpack.c.bf16 %v509_v57, %v509_v57 }
 0x29f   : > { %511 = vst [vmem:[%s222_s21] sm:$0xf] %v510_v59 }
 0x2a0 PF: > { %s15_s18 = sadd.s32 1, %s650_s18  }
 0x2a1   : > { %p12_p4 = scmp.ge.s32.totalorder %s15_s18, 4  }
 0x2a3   :  { %14 = sbr.rel (!%p12_p4) target bundleno = 1 (0x1), region = 73 }

</bundles_post_ra>
